<compile_context>
chip_gen: v6e
topology: v6e:2x2x1
jax: 0.10.0
libtpu: 0.0.40
codegen_flags: <defaults>
</compile_context>

<pallas_src>
import numpy as np
import jax
import jax.numpy as jnp
from jax.experimental import pallas as pl
from jax.experimental.pallas import tpu as pltpu

DIM_U = 36
N_SITES = 12
TILE_N_DEFAULT = 1024          # samples per grid step (multiple of 8)


def _round_up(x, m):
    return ((x + m - 1) // m) * m


def _block_diag(*mats):
    rows = sum(m.shape[0] for m in mats)
    cols = sum(m.shape[1] for m in mats)
    out = jnp.zeros((rows, cols), jnp.float32)
    r = c = 0
    for m in mats:
        out = out.at[r:r + m.shape[0], c:c + m.shape[1]].set(m)
        r += m.shape[0]
        c += m.shape[1]
    return out


# ----------------------------- fused-parameter construction ----------------

def _fused_params(net1, net2, net3, reg):
    (w11, b11), (w12, b12), (w13, b13) = net1
    (w21, b21), (w22, b22), (w23, b23) = net2
    (w31, b31), (w32, b32), (w33, b33) = net3

    # u-column indices feeding each site's three unit nets (the u1 gather and
    # all the torch wrap-around index tables reduce exactly to these).
    #   A_i = u[:, 3i], B_i = u[:, 3i+1], C_i = u[:, 3i+2]
    idx1 = [[3 * ((i - 1) % N_SITES) + 1, 3 * i, 3 * i + 1] for i in range(N_SITES)]
    idx2 = [[3 * i, 3 * i + 1, 3 * ((i + 1) % N_SITES)] for i in range(N_SITES)]
    idx3 = [[3 * i, 3 * i + 1, 3 * ((i + 1) % N_SITES),
             3 * ((i + 1) % N_SITES) + 1] for i in range(N_SITES)]

    def scatter_tensor(idx):
        k = len(idx[0])
        t = np.zeros((DIM_U, N_SITES, k), np.float32)
        for i in range(N_SITES):
            for j, col in enumerate(idx[i]):
                t[col, i, j] = 1.0
        return jnp.asarray(t)

    # Layer 1: fold the column gathers into the weights.  (36, 12, 15) -> (36, 180)
    blk1 = jnp.concatenate([
        jnp.tensordot(scatter_tensor(idx1), w11, axes=([2], [0])),
        jnp.tensordot(scatter_tensor(idx2), w21, axes=([2], [0])),
        jnp.tensordot(scatter_tensor(idx3), w31, axes=([2], [0])),
    ], axis=-1)
    W1 = blk1.reshape(DIM_U, N_SITES * 15)
    b1 = jnp.tile(jnp.concatenate([b11, b21, b31]), N_SITES).reshape(1, -1)   # (1, 180)

    # Layer 2: block-diag over sites.
    eye12 = jnp.eye(N_SITES, dtype=jnp.float32)
    W2 = jnp.kron(eye12, _block_diag(w12, w22, w32))                          # (180, 360)
    b2 = jnp.tile(jnp.concatenate([b12, b22, b32]), N_SITES).reshape(1, -1)   # (1, 360)

    # Layer 3: block-diag over sites, then fold the per-site output
    # permutations (add / *ua / *uc paths) and reg[0] into the weights/biases.
    W3 = jnp.kron(eye12, _block_diag(w13, w23, w33))                          # (360, 96)
    b3 = jnp.tile(jnp.concatenate([b13, b23, b33]), N_SITES)                  # (96,)

    P_add = np.zeros((96, DIM_U), np.float32)
    P_ma = np.zeros((96, DIM_U), np.float32)
    P_mc = np.zeros((96, DIM_U), np.float32)
    for i in range(N_SITES):
        P_add[8 * i + 0, 3 * i + 0] = 1.0
        P_add[8 * i + 3, 3 * i + 1] = 1.0
        P_add[8 * i + 6, 3 * i + 2] = 1.0
        P_ma[8 * i + 1, 3 * i + 0] = 1.0
        P_ma[8 * i + 4, 3 * i + 1] = 1.0
        P_mc[8 * i + 2, 3 * i + 0] = 1.0
        P_mc[8 * i + 5, 3 * i + 1] = 1.0
        P_mc[8 * i + 7, 3 * i + 2] = 1.0
    P_add, P_ma, P_mc = map(jnp.asarray, (P_add, P_ma, P_mc))

    W3a = W3 @ P_add
    b3a = (b3 @ P_add + reg[0]).reshape(1, DIM_U)       # reg[0] folded in
    W3ma = W3 @ P_ma
    b3ma = (b3 @ P_ma).reshape(1, DIM_U)
    W3mc = W3 @ P_mc
    b3mc = (b3 @ P_mc).reshape(1, DIM_U)

    # Constant 0/1 gathers: ua_i = u[:, (3i-1) mod 36], uc_i = u[:, 3i+2],
    # each broadcast across the 3 output columns of site i.
    GA = np.zeros((DIM_U, DIM_U), np.float32)
    GC = np.zeros((DIM_U, DIM_U), np.float32)
    for i in range(N_SITES):
        GA[(3 * i - 1) % DIM_U, 3 * i:3 * i + 3] = 1.0
        GC[3 * i + 2, 3 * i:3 * i + 3] = 1.0
    GA, GC = jnp.asarray(GA), jnp.asarray(GC)

    reg1 = jnp.reshape(reg[1], (1,)).astype(jnp.float32)
    return (W1, b1, W2, b2, W3a, b3a, W3ma, b3ma, W3mc, b3mc, GA, GC), reg1


# ----------------------------- Pallas kernel --------------------------------

def mixmodel_kernel(u_ref, w1, b1, w2, b2, w3a, b3a, w3ma, b3ma, w3mc, b3mc,
                    ga, gc, reg_ref, out_ref):
    x = u_ref[...]                                                    # (T, 36)

    # Fused block-diagonal 3-layer MLP for all 12 sites at once.
    h = jnp.maximum(
        jnp.dot(x, w1[...], preferred_element_type=jnp.float32) + b1[...], 0.0)
    h = jnp.maximum(
        jnp.dot(h, w2[...], preferred_element_type=jnp.float32) + b2[...], 0.0)

    # Output-permutation-folded heads (reg[0] already folded into b3a).
    add = jnp.dot(h, w3a[...], preferred_element_type=jnp.float32) + b3a[...]
    ma = jnp.dot(h, w3ma[...], preferred_element_type=jnp.float32) + b3ma[...]
    mc = jnp.dot(h, w3mc[...], preferred_element_type=jnp.float32) + b3mc[...]

    # Constant 0/1 column gathers of u as matmuls (keeps everything lane-dense).
    ua = jnp.dot(x, ga[...], preferred_element_type=jnp.float32)
    uc = jnp.dot(x, gc[...], preferred_element_type=jnp.float32)

    out_ref[...] = x * reg_ref[0] + add + ma * ua + mc * uc          # (T, 36)


# ----------------------------- wrapper ---------------------------------------

def mixmodel_forward(t, u, params, tile_n=TILE_N_DEFAULT):
    del t  # unused (same as the PyTorch module)
    net1, net2, net3, reg = params
    u = u.astype(jnp.float32)
    N = u.shape[0]

    weights, reg1 = _fused_params(net1, net2, net3, reg.astype(jnp.float32))

    tile_n = max(8, min(tile_n, _round_up(N, 8)))
    tile_n = (tile_n // 8) * 8
    n_pad = _round_up(N, tile_n)
    u_in = jnp.pad(u, ((0, n_pad - N), (0, 0))) if n_pad != N else u
    grid = (n_pad // tile_n,)

    vmem = pltpu.MemorySpace.VMEM

    def resident(arr):
        nd = arr.ndim
        return pl.BlockSpec(arr.shape, lambda i, _nd=nd: (0,) * _nd,
                            memory_space=vmem)

    in_specs = [pl.BlockSpec((tile_n, DIM_U), lambda i: (i, 0), memory_space=vmem)]
    in_specs += [resident(a) for a in weights]
    in_specs.append(pl.BlockSpec((1,), lambda i: (0,),
                                 memory_space=pltpu.MemorySpace.SMEM))

    out = pl.pallas_call(
        mixmodel_kernel,
        out_shape=jax.ShapeDtypeStruct((n_pad, DIM_U), jnp.float32),
        grid=grid,
        in_specs=in_specs,
        out_specs=pl.BlockSpec((tile_n, DIM_U), lambda i: (i, 0), memory_space=vmem),
        compiler_params=pltpu.CompilerParams(
            dimension_semantics=("parallel",),
            vmem_limit_bytes=32 * 1024 * 1024),
    )(u_in, *weights, reg1)

    return out[:N]


# ----------------------------- reference & init ------------------------------

def _static_indices():
    idx_u1 = np.array([i for i in range(DIM_U) if i % 3 != 2])
    d1 = len(idx_u1)
    idx1 = np.array([[(2 * i - 1) % d1, 2 * i, 2 * i + 1] for i in range(N_SITES)])
    idx2 = np.array([[2 * i, 2 * i + 1, (2 * i + 2) % d1] for i in range(N_SITES)])
    idx3 = np.array([[2 * i, 2 * i + 1, (2 * i + 2) % d1, (2 * i + 3) % d1]
                     for i in range(N_SITES)])
    idx_a = np.arange(-1, 33, 3) % DIM_U
    idx_b = np.arange(2, 36, 3)
    return idx_u1, idx1, idx2, idx3, idx_a, idx_b


def mixmodel_reference(t, u, params):
    del t
    net1, net2, net3, reg = params
    idx_u1, idx1, idx2, idx3, idx_a, idx_b = _static_indices()

    def mlp(x, layers):
        (w1, b1), (w2, b2), (w3, b3) = layers
        h = jax.nn.relu(x @ w1 + b1)
        h = jax.nn.relu(h @ w2 + b2)
        return h @ w3 + b3

    outreg = u * reg[1] + reg[0]
    u1 = u[:, idx_u1]
    o1 = mlp(u1[:, idx1], net1)        # (N, 12, 3)
    o2 = mlp(u1[:, idx2], net2)        # (N, 12, 3)
    o3 = mlp(u1[:, idx3], net3)        # (N, 12, 2)
    ua = u[:, idx_a]
    ub = u[:, idx_b]
    out = jnp.zeros_like(u)
    out = out.at[:, 0::3].set(outreg[:, 0::3] + o1[..., 0] + o1[..., 1] * ua + o1[..., 2] * ub)
    out = out.at[:, 1::3].set(outreg[:, 1::3] + o2[..., 0] + o2[..., 1] * ua + o2[..., 2] * ub)
    out = out.at[:, 2::3].set(outreg[:, 2::3] + o3[..., 0] + o3[..., 1] * ub)
    return out


def init_params(key):
    def linear(k, nin, nout):
        kw, kb = jax.random.split(k)
        w = jax.random.normal(kw, (nin, nout), jnp.float32) * 0.3
        b = jax.random.normal(kb, (nout,), jnp.float32) * 0.1
        return w, b

    keys = jax.random.split(key, 10)
    net1 = [linear(keys[0], 3, 5), linear(keys[1], 5, 10), linear(keys[2], 10, 3)]
    net2 = [linear(keys[3], 3, 5), linear(keys[4], 5, 10), linear(keys[5], 10, 3)]
    net3 = [linear(keys[6], 4, 5), linear(keys[7], 5, 10), linear(keys[8], 10, 2)]
    reg = jax.random.normal(keys[9], (2,), jnp.float32)
    return net1, net2, net3, reg


if __name__ == "__main__":
    key = jax.random.PRNGKey(0)
    k_u, k_p = jax.random.split(key)
    params = init_params(k_p)

    # Single-tile case, a multi-tile (padded) case with a small explicit tile,
    # and the default-tile case.
    cases = ((8, TILE_N_DEFAULT), (200, 64), (200, TILE_N_DEFAULT))
    for N, tn in cases:
        u = jax.random.normal(jax.random.fold_in(k_u, N), (N, DIM_U), dtype=jnp.float32)
        out = jax.block_until_ready(mixmodel_forward(0.0, u, params, tile_n=tn))
        ref = mixmodel_reference(0.0, u, params)
        assert out.shape == (N, DIM_U)
        np.testing.assert_allclose(np.asarray(out), np.asarray(ref),
                                   rtol=2e-5, atol=5e-5)
    print("KERNEL_OK")
</pallas_src>

<mosaic_0001>
module attributes {stable_mosaic.version = 11 : i64} {
  func.func @mixmodel_kernel(%arg0: i32, %arg1: memref<8x36xf32, #tpu.memory_space<vmem>>, %arg2: memref<36x180xf32, #tpu.memory_space<vmem>>, %arg3: memref<1x180xf32, #tpu.memory_space<vmem>>, %arg4: memref<180x360xf32, #tpu.memory_space<vmem>>, %arg5: memref<1x360xf32, #tpu.memory_space<vmem>>, %arg6: memref<360x36xf32, #tpu.memory_space<vmem>>, %arg7: memref<1x36xf32, #tpu.memory_space<vmem>>, %arg8: memref<360x36xf32, #tpu.memory_space<vmem>>, %arg9: memref<1x36xf32, #tpu.memory_space<vmem>>, %arg10: memref<360x36xf32, #tpu.memory_space<vmem>>, %arg11: memref<1x36xf32, #tpu.memory_space<vmem>>, %arg12: memref<36x36xf32, #tpu.memory_space<vmem>>, %arg13: memref<36x36xf32, #tpu.memory_space<vmem>>, %arg14: memref<1xf32, #tpu.memory_space<smem>>, %arg15: memref<8x36xf32, #tpu.memory_space<vmem>>) attributes {dimension_semantics = [#tpu.dimension_semantics<parallel>], iteration_bounds = array<i64: 1>, scalar_prefetch = 0 : i64, scratch_operands = 0 : i64, tpu.core_type = #tpu.core_type<tc>, window_params = [{transform_indices = @transform_0, window_bounds = array<i64: 8, 36>}, {pipeline_mode = #tpu.pipeline_mode<synchronous>, transform_indices = @transform_1, window_bounds = array<i64: 36, 180>}, {pipeline_mode = #tpu.pipeline_mode<synchronous>, transform_indices = @transform_2, window_bounds = array<i64: 1, 180>}, {pipeline_mode = #tpu.pipeline_mode<synchronous>, transform_indices = @transform_3, window_bounds = array<i64: 180, 360>}, {pipeline_mode = #tpu.pipeline_mode<synchronous>, transform_indices = @transform_4, window_bounds = array<i64: 1, 360>}, {pipeline_mode = #tpu.pipeline_mode<synchronous>, transform_indices = @transform_5, window_bounds = array<i64: 360, 36>}, {pipeline_mode = #tpu.pipeline_mode<synchronous>, transform_indices = @transform_6, window_bounds = array<i64: 1, 36>}, {pipeline_mode = #tpu.pipeline_mode<synchronous>, transform_indices = @transform_7, window_bounds = array<i64: 360, 36>}, {pipeline_mode = #tpu.pipeline_mode<synchronous>, transform_indices = @transform_8, window_bounds = array<i64: 1, 36>}, {pipeline_mode = #tpu.pipeline_mode<synchronous>, transform_indices = @transform_9, window_bounds = array<i64: 360, 36>}, {pipeline_mode = #tpu.pipeline_mode<synchronous>, transform_indices = @transform_10, window_bounds = array<i64: 1, 36>}, {pipeline_mode = #tpu.pipeline_mode<synchronous>, transform_indices = @transform_11, window_bounds = array<i64: 36, 36>}, {pipeline_mode = #tpu.pipeline_mode<synchronous>, transform_indices = @transform_12, window_bounds = array<i64: 36, 36>}, {transform_indices = @transform_13, window_bounds = array<i64: 1>}, {transform_indices = @transform_14, window_bounds = array<i64: 8, 36>}]} {
    %c0 = arith.constant 0 : index
    %c0_0 = arith.constant 0 : index
    %0 = vector.load %arg1[%c0, %c0_0] : memref<8x36xf32, #tpu.memory_space<vmem>>, vector<8x36xf32>
    %c0_1 = arith.constant 0 : index
    %c0_2 = arith.constant 0 : index
    %1 = vector.load %arg2[%c0_1, %c0_2] : memref<36x180xf32, #tpu.memory_space<vmem>>, vector<36x180xf32>
    %cst = arith.constant dense<0.000000e+00> : vector<8x180xf32>
    %2 = tpu.matmul %0, %1, %cst {dimension_numbers = #tpu.dot_dimension_numbers<[1], [0], [0], [1], [0, 0, 1, 1], [], []>} : vector<8x36xf32>, vector<36x180xf32>, vector<8x180xf32> -> vector<8x180xf32>
    %c0_3 = arith.constant 0 : index
    %c0_4 = arith.constant 0 : index
    %3 = vector.load %arg3[%c0_3, %c0_4] : memref<1x180xf32, #tpu.memory_space<vmem>>, vector<1x180xf32>
    %4 = vector.broadcast %3 : vector<1x180xf32> to vector<8x180xf32>
    %5 = arith.addf %2, %4 : vector<8x180xf32>
    %cst_5 = arith.constant 0.000000e+00 : f32
    %6 = vector.broadcast %cst_5 : f32 to vector<8x180xf32>
    %7 = arith.maximumf %5, %6 : vector<8x180xf32>
    %c0_6 = arith.constant 0 : index
    %c0_7 = arith.constant 0 : index
    %8 = vector.load %arg4[%c0_6, %c0_7] : memref<180x360xf32, #tpu.memory_space<vmem>>, vector<180x360xf32>
    %cst_8 = arith.constant dense<0.000000e+00> : vector<8x360xf32>
    %9 = tpu.matmul %7, %8, %cst_8 {dimension_numbers = #tpu.dot_dimension_numbers<[1], [0], [0], [1], [0, 0, 1, 1], [], []>} : vector<8x180xf32>, vector<180x360xf32>, vector<8x360xf32> -> vector<8x360xf32>
    %c0_9 = arith.constant 0 : index
    %c0_10 = arith.constant 0 : index
    %10 = vector.load %arg5[%c0_9, %c0_10] : memref<1x360xf32, #tpu.memory_space<vmem>>, vector<1x360xf32>
    %11 = vector.broadcast %10 : vector<1x360xf32> to vector<8x360xf32>
    %12 = arith.addf %9, %11 : vector<8x360xf32>
    %cst_11 = arith.constant 0.000000e+00 : f32
    %13 = vector.broadcast %cst_11 : f32 to vector<8x360xf32>
    %14 = arith.maximumf %12, %13 : vector<8x360xf32>
    %c0_12 = arith.constant 0 : index
    %c0_13 = arith.constant 0 : index
    %15 = vector.load %arg6[%c0_12, %c0_13] : memref<360x36xf32, #tpu.memory_space<vmem>>, vector<360x36xf32>
    %cst_14 = arith.constant dense<0.000000e+00> : vector<8x36xf32>
    %16 = tpu.matmul %14, %15, %cst_14 {dimension_numbers = #tpu.dot_dimension_numbers<[1], [0], [0], [1], [0, 0, 1, 1], [], []>} : vector<8x360xf32>, vector<360x36xf32>, vector<8x36xf32> -> vector<8x36xf32>
    %c0_15 = arith.constant 0 : index
    %c0_16 = arith.constant 0 : index
    %17 = vector.load %arg7[%c0_15, %c0_16] : memref<1x36xf32, #tpu.memory_space<vmem>>, vector<1x36xf32>
    %18 = vector.broadcast %17 : vector<1x36xf32> to vector<8x36xf32>
    %19 = arith.addf %16, %18 : vector<8x36xf32>
    %c0_17 = arith.constant 0 : index
    %c0_18 = arith.constant 0 : index
    %20 = vector.load %arg8[%c0_17, %c0_18] : memref<360x36xf32, #tpu.memory_space<vmem>>, vector<360x36xf32>
    %cst_19 = arith.constant dense<0.000000e+00> : vector<8x36xf32>
    %21 = tpu.matmul %14, %20, %cst_19 {dimension_numbers = #tpu.dot_dimension_numbers<[1], [0], [0], [1], [0, 0, 1, 1], [], []>} : vector<8x360xf32>, vector<360x36xf32>, vector<8x36xf32> -> vector<8x36xf32>
    %c0_20 = arith.constant 0 : index
    %c0_21 = arith.constant 0 : index
    %22 = vector.load %arg9[%c0_20, %c0_21] : memref<1x36xf32, #tpu.memory_space<vmem>>, vector<1x36xf32>
    %23 = vector.broadcast %22 : vector<1x36xf32> to vector<8x36xf32>
    %24 = arith.addf %21, %23 : vector<8x36xf32>
    %c0_22 = arith.constant 0 : index
    %c0_23 = arith.constant 0 : index
    %25 = vector.load %arg10[%c0_22, %c0_23] : memref<360x36xf32, #tpu.memory_space<vmem>>, vector<360x36xf32>
    %cst_24 = arith.constant dense<0.000000e+00> : vector<8x36xf32>
    %26 = tpu.matmul %14, %25, %cst_24 {dimension_numbers = #tpu.dot_dimension_numbers<[1], [0], [0], [1], [0, 0, 1, 1], [], []>} : vector<8x360xf32>, vector<360x36xf32>, vector<8x36xf32> -> vector<8x36xf32>
    %c0_25 = arith.constant 0 : index
    %c0_26 = arith.constant 0 : index
    %27 = vector.load %arg11[%c0_25, %c0_26] : memref<1x36xf32, #tpu.memory_space<vmem>>, vector<1x36xf32>
    %28 = vector.broadcast %27 : vector<1x36xf32> to vector<8x36xf32>
    %29 = arith.addf %26, %28 : vector<8x36xf32>
    %c0_27 = arith.constant 0 : index
    %c0_28 = arith.constant 0 : index
    %30 = vector.load %arg12[%c0_27, %c0_28] : memref<36x36xf32, #tpu.memory_space<vmem>>, vector<36x36xf32>
    %cst_29 = arith.constant dense<0.000000e+00> : vector<8x36xf32>
    %31 = tpu.matmul %0, %30, %cst_29 {dimension_numbers = #tpu.dot_dimension_numbers<[1], [0], [0], [1], [0, 0, 1, 1], [], []>} : vector<8x36xf32>, vector<36x36xf32>, vector<8x36xf32> -> vector<8x36xf32>
    %c0_30 = arith.constant 0 : index
    %c0_31 = arith.constant 0 : index
    %32 = vector.load %arg13[%c0_30, %c0_31] : memref<36x36xf32, #tpu.memory_space<vmem>>, vector<36x36xf32>
    %cst_32 = arith.constant dense<0.000000e+00> : vector<8x36xf32>
    %33 = tpu.matmul %0, %32, %cst_32 {dimension_numbers = #tpu.dot_dimension_numbers<[1], [0], [0], [1], [0, 0, 1, 1], [], []>} : vector<8x36xf32>, vector<36x36xf32>, vector<8x36xf32> -> vector<8x36xf32>
    %c0_33 = arith.constant 0 : index
    %34 = memref.load %arg14[%c0_33] : memref<1xf32, #tpu.memory_space<smem>>
    %35 = vector.broadcast %34 : f32 to vector<8x36xf32>
    %36 = arith.mulf %0, %35 : vector<8x36xf32>
    %37 = arith.addf %36, %19 : vector<8x36xf32>
    %38 = arith.mulf %24, %31 : vector<8x36xf32>
    %39 = arith.addf %37, %38 : vector<8x36xf32>
    %40 = arith.mulf %29, %33 : vector<8x36xf32>
    %41 = arith.addf %39, %40 : vector<8x36xf32>
    %c0_34 = arith.constant 0 : index
    %c0_35 = arith.constant 0 : index
    %42 = vector.load %arg15[%c0_34, %c0_35] : memref<8x36xf32, #tpu.memory_space<vmem>>, vector<8x36xf32>
    tpu.vector_store %arg15[%c0_34, %c0_35], %41 {strides = array<i32>} : memref<8x36xf32, #tpu.memory_space<vmem>>, vector<8x36xf32>,
    return
  }
  func.func @transform_0(%arg0: i32) -> (i32, i32) {
    %c0_i32 = arith.constant 0 : i32
    %c0_i32_0 = arith.constant 0 : i32
    return %arg0, %c0_i32 : i32, i32
  }
  func.func @transform_1(%arg0: i32) -> (i32, i32) {
    %c0_i32 = arith.constant 0 : i32
    %c0_i32_0 = arith.constant 0 : i32
    %c0_i32_1 = arith.constant 0 : i32
    return %c0_i32, %c0_i32_0 : i32, i32
  }
  func.func @transform_2(%arg0: i32) -> (i32, i32) {
    %c0_i32 = arith.constant 0 : i32
    %c0_i32_0 = arith.constant 0 : i32
    %c0_i32_1 = arith.constant 0 : i32
    return %c0_i32, %c0_i32_0 : i32, i32
  }
  func.func @transform_3(%arg0: i32) -> (i32, i32) {
    %c0_i32 = arith.constant 0 : i32
    %c0_i32_0 = arith.constant 0 : i32
    %c0_i32_1 = arith.constant 0 : i32
    return %c0_i32, %c0_i32_0 : i32, i32
  }
  func.func @transform_4(%arg0: i32) -> (i32, i32) {
    %c0_i32 = arith.constant 0 : i32
    %c0_i32_0 = arith.constant 0 : i32
    %c0_i32_1 = arith.constant 0 : i32
    return %c0_i32, %c0_i32_0 : i32, i32
  }
  func.func @transform_5(%arg0: i32) -> (i32, i32) {
    %c0_i32 = arith.constant 0 : i32
    %c0_i32_0 = arith.constant 0 : i32
    %c0_i32_1 = arith.constant 0 : i32
    return %c0_i32, %c0_i32_0 : i32, i32
  }
  func.func @transform_6(%arg0: i32) -> (i32, i32) {
    %c0_i32 = arith.constant 0 : i32
    %c0_i32_0 = arith.constant 0 : i32
    %c0_i32_1 = arith.constant 0 : i32
    return %c0_i32, %c0_i32_0 : i32, i32
  }
  func.func @transform_7(%arg0: i32) -> (i32, i32) {
    %c0_i32 = arith.constant 0 : i32
    %c0_i32_0 = arith.constant 0 : i32
    %c0_i32_1 = arith.constant 0 : i32
    return %c0_i32, %c0_i32_0 : i32, i32
  }
  func.func @transform_8(%arg0: i32) -> (i32, i32) {
    %c0_i32 = arith.constant 0 : i32
    %c0_i32_0 = arith.constant 0 : i32
    %c0_i32_1 = arith.constant 0 : i32
    return %c0_i32, %c0_i32_0 : i32, i32
  }
  func.func @transform_9(%arg0: i32) -> (i32, i32) {
    %c0_i32 = arith.constant 0 : i32
    %c0_i32_0 = arith.constant 0 : i32
    %c0_i32_1 = arith.constant 0 : i32
    return %c0_i32, %c0_i32_0 : i32, i32
  }
  func.func @transform_10(%arg0: i32) -> (i32, i32) {
    %c0_i32 = arith.constant 0 : i32
    %c0_i32_0 = arith.constant 0 : i32
    %c0_i32_1 = arith.constant 0 : i32
    return %c0_i32, %c0_i32_0 : i32, i32
  }
  func.func @transform_11(%arg0: i32) -> (i32, i32) {
    %c0_i32 = arith.constant 0 : i32
    %c0_i32_0 = arith.constant 0 : i32
    %c0_i32_1 = arith.constant 0 : i32
    return %c0_i32, %c0_i32_0 : i32, i32
  }
  func.func @transform_12(%arg0: i32) -> (i32, i32) {
    %c0_i32 = arith.constant 0 : i32
    %c0_i32_0 = arith.constant 0 : i32
    %c0_i32_1 = arith.constant 0 : i32
    return %c0_i32, %c0_i32_0 : i32, i32
  }
  func.func @transform_13(%arg0: i32) -> i32 {
    %c0_i32 = arith.constant 0 : i32
    %c0_i32_0 = arith.constant 0 : i32
    return %c0_i32 : i32
  }
  func.func @transform_14(%arg0: i32) -> (i32, i32) {
    %c0_i32 = arith.constant 0 : i32
    %c0_i32_0 = arith.constant 0 : i32
    return %arg0, %c0_i32 : i32, i32
  }
}

</mosaic_0001>

<bundles_post_ra>
// kernel: tpu_custom_call.1
= control target key start
LH: loop header
LB: loop body
LE: loop exit
PB: predicated region body
PF: predicated region fallthrough
CT: control target
= control target key end

     0   :  { %vm76_vm0 = vcmask 1043456   ;;  %v1474_v5 = vmov 0.0   ;;  %vm72_vm1 = vcmask 293888   ;;  %s2376_s0 = inlined_call_operand.vmem [shape: f32[8,36], index: 0, kind: input, shape index: {}]   ;;  %s2377_s1 = inlined_call_operand.vmem [shape: f32[36,180], index: 1, kind: input, shape index: {}]   ;;  %s2378_s2 = inlined_call_operand.vmem [shape: f32[1,180], index: 2, kind: input, shape index: {}]   ;;  %s2379_s3 = inlined_call_operand.vmem [shape: f32[180,360], index: 3, kind: input, shape index: {}]   ;;  %s2380_s4 = inlined_call_operand.vmem [shape: f32[1,360], index: 4, kind: input, shape index: {}]   ;;  %s2381_s5 = inlined_call_operand.vmem [shape: f32[360,36], index: 5, kind: input, shape index: {}]   ;;  %s2382_s6 = inlined_call_operand.vmem [shape: f32[1,36], index: 6, kind: input, shape index: {}]   ;;  %s2383_s7 = inlined_call_operand.vmem [shape: f32[360,36], index: 7, kind: input, shape index: {}]   ;;  %s2384_s8 = inlined_call_operand.vmem [shape: f32[1,36], index: 8, kind: input, shape index: {}]   ;;  %s2385_s9 = inlined_call_operand.vmem [shape: f32[360,36], index: 9, kind: input, shape index: {}]   ;;  %s2386_s10 = inlined_call_operand.vmem [shape: f32[1,36], index: 10, kind: input, shape index: {}]   ;;  %s2387_s11 = inlined_call_operand.vmem [shape: f32[36,36], index: 11, kind: input, shape index: {}]   ;;  %s2388_s12 = inlined_call_operand.vmem [shape: f32[36,36], index: 12, kind: input, shape index: {}]   ;;  %s2389_s13 = inlined_call_operand.<no memory space> [shape: f32[1], index: 13, kind: input, shape index: {}]   ;;  %s2390_s14 = inlined_call_operand.hbm [shape: f32[8,36], index: 14, kind: output, shape index: {}]  }
   0x1   :  { %v59_v0 = vld [vmem:[%s2377_s1 + $0x48] sm:$0xf]  ;;  %v58_v1 = vld [vmem:[%s2377_s1 + $0x40] sm:$0xf]  ;;  %v57_v2 = vld [vmem:[%s2377_s1 + $0x38] sm:$0xff]  ;;  %147 = vmatprep.mubr.f32.mxu0 %v1474_v5 }
   0x2   :  { %1158 = vmatprep.subr.msk.mxu0 %vm76_vm0, %v59_v0  ;;  %v56_v3 = vld [vmem:[%s2377_s1 + $0x30] sm:$0xff]  ;;  %v55_v4 = vld [vmem:[%s2377_s1 + $0x28] sm:$0xff]  ;;  %v54_v6 = vld [vmem:[%s2377_s1 + $0x20] sm:$0xff] }
   0x3   :  { %1159 = vmatpush1.msk.msra.mxu0 %vm76_vm0, %v58_v1  ;;  %v202_v7 = vld [vmem:[%s2379_s3 + $0x170] sm:$0xff]  ;;  %v53_v8 = vld [vmem:[%s2377_s1 + $0x18] sm:$0xff]  ;;  %v201_v9 = vld [vmem:[%s2379_s3 + $0x168] sm:$0xff] }
   0x4   :  { %107 = vmatprep.subr.mxu0 %v57_v2  ;;  %255 = vmatprep.subr.mxu1 %v202_v7  ;;  %v199_v10 = vld [vmem:[%s2379_s3 + $0x158] sm:$0xff]  ;;  %v52_v11 = vld [vmem:[%s2377_s1 + $0x10] sm:$0xff]  ;;  %v196_v13 = vld [vmem:[%s2379_s3 + $0x140] sm:$0xff] }
   0x5   :  { %108 = vmatpush1.msra.mxu0 %v56_v3  ;;  %256 = vmatpush1.msra.mxu1 %v201_v9  ;;  %v198_v12 = vld [vmem:[%s2379_s3 + $0x150] sm:$0xff]  ;;  %v51_v14 = vld [vmem:[%s2377_s1 + $0x8] sm:$0xff]  ;;  %v195_v15 = vld [vmem:[%s2379_s3 + $0x138] sm:$0xff] }
   0x6   :  { %109 = vmatprep.subr.mxu0 %v55_v4  ;;  %257 = vmatprep.subr.mxu1 %v199_v10  ;;  %v50_v16 = vld [vmem:[%s2377_s1] sm:$0xff]  ;;  %v193_v17 = vld [vmem:[%s2379_s3 + $0x128] sm:$0xff]  ;;  %v203_v19 = vld [vmem:[%s2379_s3 + $0x178] sm:$0xff] }
   0x7   :  { %110 = vmatpush1.msra.mxu0 %v54_v6  ;;  %258 = vmatpush1.msra.mxu1 %v198_v12  ;;  %v49_v18 = vld [vmem:[%s2376_s0] sm:$0xff]  ;;  %v190_v21 = vld [vmem:[%s2379_s3 + $0x110] sm:$0xff]  ;;  %v189_v23 = vld [vmem:[%s2379_s3 + $0x108] sm:$0xff] }
   0x8   :  { %111 = vmatprep.subr.mxu0 %v53_v8  ;;  %259 = vmatprep.subr.mxu1 %v196_v13  ;;  %v192_v20 = vld [vmem:[%s2379_s3 + $0x120] sm:$0xff]  ;;  %v187_v24 = vld [vmem:[%s2379_s3 + $0xf8] sm:$0xff]  ;;  %v197_v25 = vld [vmem:[%s2379_s3 + $0x148] sm:$0xff] }
   0x9   :  { %112 = vmatpush1.msra.mxu0 %v52_v11  ;;  %260 = vmatpush1.msra.mxu1 %v195_v15  ;;  %v200_v22 = vld [vmem:[%s2379_s3 + $0x160] sm:$0xff]  ;;  %v186_v26 = vld [vmem:[%s2379_s3 + $0xf0] sm:$0xff]  ;;  %v183_v29 = vld [vmem:[%s2379_s3 + $0xd8] sm:$0xff] }
   0xa   :  { %113 = vmatprep.subr.mxu0 %v51_v14  ;;  %261 = vmatprep.subr.mxu1 %v193_v17  ;;  %v184_v27 = vld [vmem:[%s2379_s3 + $0xe0] sm:$0xff]  ;;  %v194_v28 = vld [vmem:[%s2379_s3 + $0x130] sm:$0xff]  ;;  %v181_v30 = vld [vmem:[%s2379_s3 + $0xc8] sm:$0xff] }
   0xb   :  { %114 = vmatpush1.msra.mxu0 %v50_v16  ;;  %262 = vmatpush1.msra.mxu1 %v192_v20  ;;  %v191_v31 = vld [vmem:[%s2379_s3 + $0x118] sm:$0xff]  ;;  %v180_v32 = vld [vmem:[%s2379_s3 + $0xc0] sm:$0xff]  ;;  %v178_v33 = vld [vmem:[%s2379_s3 + $0xb0] sm:$0xff] }
   0xc   :  { %1160 = vmatmul.mubr.msk.f32.vlgmr.msra.gmra.mxu0 %vm72_vm1, %v49_v18  ;;  %326 = vmatprep.subr.mxu0 %v1474_v5  ;;  %v188_v34 = vld [vmem:[%s2379_s3 + $0x100] sm:$0xff]  ;;  %v177_v35 = vld [vmem:[%s2379_s3 + $0xa8] sm:$0xff]  ;;  %v175_v36 = vld [vmem:[%s2379_s3 + $0x98] sm:$0xff] }
   0xd   :  { %327 = vmatpush1.msra.mxu0 %v203_v19  ;;  %263 = vmatprep.subr.mxu1 %v190_v21  ;;  %v185_v37 = vld [vmem:[%s2379_s3 + $0xe8] sm:$0xff]  ;;  %v174_v38 = vld [vmem:[%s2379_s3 + $0x90] sm:$0xff]  ;;  %v172_v39 = vld [vmem:[%s2379_s3 + $0x80] sm:$0xff] }
   0xe   :  { %328 = vmatprep.subr.mxu0 %v1474_v5  ;;  %264 = vmatpush1.msra.mxu1 %v189_v23  ;;  %v182_v40 = vld [vmem:[%s2379_s3 + $0xd0] sm:$0xff]  ;;  %v171_v41 = vld [vmem:[%s2379_s3 + $0x78] sm:$0xff] }
   0xf   :  { %329 = vmatpush1.msra.mxu0 %v200_v22  ;;  %265 = vmatprep.subr.mxu1 %v187_v24 }
  0x10   :  { %330 = vmatprep.subr.mxu0 %v1474_v5  ;;  %266 = vmatpush1.msra.mxu1 %v186_v26 }
  0x11   :  { %331 = vmatpush1.msra.mxu0 %v197_v25  ;;  %267 = vmatprep.subr.mxu1 %v184_v27 }
  0x12   :  { %332 = vmatprep.subr.mxu0 %v1474_v5  ;;  %268 = vmatpush1.msra.mxu1 %v183_v29 }
  0x13   :  { %333 = vmatpush1.msra.mxu0 %v194_v28  ;;  %269 = vmatprep.subr.mxu1 %v181_v30 }
  0x14   :  { %334 = vmatprep.subr.mxu0 %v1474_v5  ;;  %270 = vmatpush1.msra.mxu1 %v180_v32 }
  0x15   :  { %335 = vmatpush1.msra.mxu0 %v191_v31  ;;  %271 = vmatprep.subr.mxu1 %v178_v33 }
  0x16   :  { %336 = vmatprep.subr.mxu0 %v1474_v5  ;;  %272 = vmatpush1.msra.mxu1 %v177_v35 }
  0x17   :  { %337 = vmatpush1.msra.mxu0 %v188_v34  ;;  %273 = vmatprep.subr.mxu1 %v175_v36 }
  0x18   :  { %338 = vmatprep.subr.mxu0 %v1474_v5 }
  0x19   :  { %20 = vsyncpa [#allocation4], 0  ;;  %339 = vmatpush1.msra.mxu0 %v185_v37  ;;  %274 = vmatpush1.msra.mxu1 %v174_v38  ;;  %v169_v42 = vld [vmem:[%s2379_s3 + $0x68] sm:$0xff]  ;;  %v179_v43 = vld [vmem:[%s2379_s3 + $0xb8] sm:$0xff]  ;;  %v62_v19 = vlaneseq  ;;  %vm242_vm2 = vcmask 424960   ;;  %vm1475_vm3 = vmmov 0  }
  0x1a   :  { %340 = vmatprep.subr.mxu0 %v1474_v5  ;;  %275 = vmatprep.subr.mxu1 %v172_v39  ;;  %v168_v44 = vld [vmem:[%s2379_s3 + $0x60] sm:$0xff]  ;;  %v166_v45 = vld [vmem:[%s2379_s3 + $0x50] sm:$0xff]  ;;  %v165_v47 = vld [vmem:[%s2379_s3 + $0x48] sm:$0xff]  ;;  %vm451_vm4 = vcmask 850944  }
  0x1b   :  { %341 = vmatpush1.msra.mxu0 %v182_v40  ;;  %276 = vmatpush1.msra.mxu1 %v171_v41  ;;  %v176_v46 = vld [vmem:[%s2379_s3 + $0xa0] sm:$0xff]  ;;  %v163_v48 = vld [vmem:[%s2379_s3 + $0x38] sm:$0xff]  ;;  %v173_v49 = vld [vmem:[%s2379_s3 + $0x88] sm:$0xff]  ;;  %v1826_v20 = vshrl.u32 %v62_v19, 7 }
  0x1c   :  { %342 = vmatprep.subr.mxu0 %v1474_v5  ;;  %277 = vmatprep.subr.mxu1 %v169_v42  ;;  %v162_v50 = vld [vmem:[%s2379_s3 + $0x30] sm:$0xff]  ;;  %v160_v51 = vld [vmem:[%s2379_s3 + $0x20] sm:$0xff]  ;;  %v159_v53 = vld [vmem:[%s2379_s3 + $0x18] sm:$0xff] }
  0x1d   :  { %343 = vmatpush1.msra.mxu0 %v179_v43  ;;  %278 = vmatpush1.msra.mxu1 %v168_v44  ;;  %v170_v52 = vld [vmem:[%s2379_s3 + $0x70] sm:$0xff]  ;;  %v157_v54 = vld [vmem:[%s2379_s3 + $0x8] sm:$0xff]  ;;  %v167_v55 = vld [vmem:[%s2379_s3 + $0x58] sm:$0xff]  ;;  %v64_v21 = vsub.s32 0, %v1826_v20  ;;  %v68_v23 = vsub.s32 1, %v1826_v20 }
  0x1e   :  { %344 = vmatprep.subr.mxu0 %v1474_v5  ;;  %279 = vmatprep.subr.mxu1 %v166_v45  ;;  %v156_v56 = vld [vmem:[%s2379_s3] sm:$0xff]  ;;  %v223_v57 = vld [vmem:[%s2379_s3 + $0x218] sm:$0xf]  ;;  %v222_v59 = vld [vmem:[%s2379_s3 + $0x210] sm:$0xf] }
  0x1f   :  { %345 = vmatpush1.msra.mxu0 %v176_v46  ;;  %280 = vmatpush1.msra.mxu1 %v165_v47  ;;  %v164_v58 = vld [vmem:[%s2379_s3 + $0x40] sm:$0xff]  ;;  %v161_v61 = vld [vmem:[%s2379_s3 + $0x28] sm:$0xff]  ;;  %v219_v62 = vld [vmem:[%s2379_s3 + $0x1f8] sm:$0xff] }
  0x20   :  { %346 = vmatprep.subr.mxu0 %v1474_v5  ;;  %281 = vmatprep.subr.mxu1 %v163_v48  ;;  %v220_v60 = vld [vmem:[%s2379_s3 + $0x200] sm:$0xff]  ;;  %v217_v63 = vld [vmem:[%s2379_s3 + $0x1e8] sm:$0xff]  ;;  %v158_v0 = vld [vmem:[%s2379_s3 + $0x10] sm:$0xff] }
  0x21   :  { %347 = vmatpush1.msra.mxu0 %v173_v49  ;;  %282 = vmatpush1.msra.mxu1 %v162_v50  ;;  %v216_v1 = vld [vmem:[%s2379_s3 + $0x1e0] sm:$0xff]  ;;  %v221_v3 = vld [vmem:[%s2379_s3 + $0x208] sm:$0xff]  ;;  %v218_v4 = vld [vmem:[%s2379_s3 + $0x1f0] sm:$0xff] }
  0x22   :  { %348 = vmatprep.subr.mxu0 %v1474_v5  ;;  %283 = vmatprep.subr.mxu1 %v160_v51  ;;  %v224_v2 = vld [vmem:[%s2379_s3 + $0x220] sm:$0xf]  ;;  %v214_v6 = vld [vmem:[%s2379_s3 + $0x1d0] sm:$0xff]  ;;  %v213_v7 = vld [vmem:[%s2379_s3 + $0x1c8] sm:$0xff] }
  0x23   :  { %349 = vmatpush1.msra.mxu0 %v170_v52  ;;  %284 = vmatpush1.msra.mxu1 %v159_v53  ;;  %v215_v8 = vld [vmem:[%s2379_s3 + $0x1d8] sm:$0xff]  ;;  %v210_v10 = vld [vmem:[%s2379_s3 + $0x1b0] sm:$0xff]  ;;  %v212_v11 = vld [vmem:[%s2379_s3 + $0x1c0] sm:$0xff] }
  0x24   :  { %350 = vmatprep.subr.mxu0 %v1474_v5  ;;  %285 = vmatprep.subr.mxu1 %v157_v54  ;;  %v211_v9 = vld [vmem:[%s2379_s3 + $0x1b8] sm:$0xff]  ;;  %v208_v12 = vld [vmem:[%s2379_s3 + $0x1a0] sm:$0xff]  ;;  %v209_v14 = vld [vmem:[%s2379_s3 + $0x1a8] sm:$0xff] }
  0x25   :  { %351 = vmatpush1.msra.mxu0 %v167_v55  ;;  %286 = vmatpush1.msra.mxu1 %v156_v56  ;;  %v207_v13 = vld [vmem:[%s2379_s3 + $0x198] sm:$0xff]  ;;  %v205_v15 = vld [vmem:[%s2379_s3 + $0x188] sm:$0xff]  ;;  %v204_v16 = vld [vmem:[%s2379_s3 + $0x180] sm:$0xff] }
  0x26   :  { %352 = vmatprep.subr.mxu0 %v1474_v5  ;;  %1161 = vmatprep.subr.msk.mxu1 %vm76_vm0, %v223_v57  ;;  %v206_v17 = vld [vmem:[%s2379_s3 + $0x190] sm:$0xff]  ;;  %v430_v18 = vld [vmem:[%s2381_s5 + $0xf8] sm:$0xff]  ;;  %v60_v22 = vld [vmem:[%s2378_s2] sm:$0x3] }
  0x27   :  { %353 = vmatpush1.msra.mxu0 %v164_v58  ;;  %1162 = vmatpush2.msk.msra.mxu1 %vm76_vm0, %v222_v59  ;;  %v65_v24 = vrot.slane %v60_v22, %v64_v21  ;;  %v69_v25 = vrot.slane %v60_v22, %v68_v23  ;;  %v414_v32 = vld [vmem:[%s2381_s5 + $0x78] sm:$0xff]  ;;  %v443_v33 = vld [vmem:[%s2381_s5 + $0x160] sm:$0xff]  ;;  %v429_v34 = vld [vmem:[%s2381_s5 + $0xf0] sm:$0xff] }
  0x28   :  { %354 = vmatprep.subr.mxu0 %v1474_v5  ;;  %307 = vmatprep.subr.mxu1 %v220_v60  ;;  %v413_v35 = vld [vmem:[%s2381_s5 + $0x70] sm:$0xff]  ;;  %v442_v36 = vld [vmem:[%s2381_s5 + $0x158] sm:$0xff]  ;;  %v428_v37 = vld [vmem:[%s2381_s5 + $0xe8] sm:$0xff] }
  0x29   :  { %355 = vmatpush1.msra.mxu0 %v161_v61  ;;  %308 = vmatpush2.msra.mxu1 %v219_v62  ;;  %v412_v38 = vld [vmem:[%s2381_s5 + $0x68] sm:$0xff]  ;;  %v441_v39 = vld [vmem:[%s2381_s5 + $0x150] sm:$0xff]  ;;  %v427_v40 = vld [vmem:[%s2381_s5 + $0xe0] sm:$0xff] }
  0x2a   :  { %356 = vmatprep.subr.mxu0 %v1474_v5  ;;  %309 = vmatprep.subr.mxu1 %v217_v63  ;;  %v411_v41 = vld [vmem:[%s2381_s5 + $0x60] sm:$0xff]  ;;  %v440_v42 = vld [vmem:[%s2381_s5 + $0x148] sm:$0xff]  ;;  %v426_v43 = vld [vmem:[%s2381_s5 + $0xd8] sm:$0xff] }
  0x2b   :  { %357 = vmatpush1.msra.mxu0 %v158_v0  ;;  %310 = vmatpush2.msra.mxu1 %v216_v1  ;;  %v410_v44 = vld [vmem:[%s2381_s5 + $0x58] sm:$0xff]  ;;  %v439_v45 = vld [vmem:[%s2381_s5 + $0x140] sm:$0xff]  ;;  %v425_v46 = vld [vmem:[%s2381_s5 + $0xd0] sm:$0xff] }
  0x2c   :  { %376 = vmatprep.subr.mxu0 %v1474_v5  ;;  %311 = vmatprep.subr.mxu1 %v214_v6  ;;  %v409_v47 = vld [vmem:[%s2381_s5 + $0x50] sm:$0xff]  ;;  %v438_v48 = vld [vmem:[%s2381_s5 + $0x138] sm:$0xff]  ;;  %v424_v49 = vld [vmem:[%s2381_s5 + $0xc8] sm:$0xff] }
  0x2d   :  { %1164 = vmatpush2.msk.msra.mxu0 %vm76_vm0, %v224_v2  ;;  %312 = vmatpush2.msra.mxu1 %v213_v7  ;;  %v408_v50 = vld [vmem:[%s2381_s5 + $0x48] sm:$0xff]  ;;  %v437_v51 = vld [vmem:[%s2381_s5 + $0x130] sm:$0xff]  ;;  %v423_v52 = vld [vmem:[%s2381_s5 + $0xc0] sm:$0xff] }
  0x2e   :  { %378 = vmatprep.subr.mxu0 %v1474_v5  ;;  %313 = vmatprep.subr.mxu1 %v211_v9  ;;  %v407_v53 = vld [vmem:[%s2381_s5 + $0x40] sm:$0xff]  ;;  %v436_v54 = vld [vmem:[%s2381_s5 + $0x128] sm:$0xff]  ;;  %v422_v55 = vld [vmem:[%s2381_s5 + $0xb8] sm:$0xff] }
  0x2f   :  { %379 = vmatpush2.msra.mxu0 %v221_v3  ;;  %314 = vmatpush2.msra.mxu1 %v210_v10  ;;  %v406_v56 = vld [vmem:[%s2381_s5 + $0x38] sm:$0xff]  ;;  %v435_v57 = vld [vmem:[%s2381_s5 + $0x120] sm:$0xff]  ;;  %v421_v58 = vld [vmem:[%s2381_s5 + $0xb0] sm:$0xff] }
  0x30   :  { %380 = vmatprep.subr.mxu0 %v1474_v5  ;;  %315 = vmatprep.subr.mxu1 %v208_v12  ;;  %v405_v59 = vld [vmem:[%s2381_s5 + $0x30] sm:$0xff]  ;;  %v434_v60 = vld [vmem:[%s2381_s5 + $0x118] sm:$0xff]  ;;  %v420_v61 = vld [vmem:[%s2381_s5 + $0xa8] sm:$0xff] }
  0x31   :  { %381 = vmatpush2.msra.mxu0 %v218_v4  ;;  %316 = vmatpush2.msra.mxu1 %v207_v13  ;;  %v404_v62 = vld [vmem:[%s2381_s5 + $0x28] sm:$0xff]  ;;  %v433_v63 = vld [vmem:[%s2381_s5 + $0x110] sm:$0xff]  ;;  %v419_v0 = vld [vmem:[%s2381_s5 + $0xa0] sm:$0xff] }
  0x32   :  { %382 = vmatprep.subr.mxu0 %v1474_v5  ;;  %317 = vmatprep.subr.mxu1 %v205_v15  ;;  %v403_v1 = vld [vmem:[%s2381_s5 + $0x20] sm:$0xff]  ;;  %v418_v2 = vld [vmem:[%s2381_s5 + $0x98] sm:$0xff]  ;;  %v417_v4 = vld [vmem:[%s2381_s5 + $0x90] sm:$0xff] }
  0x33   :  { %383 = vmatpush2.msra.mxu0 %v215_v8  ;;  %318 = vmatpush2.msra.mxu1 %v204_v16  ;;  %v402_v3 = vld [vmem:[%s2381_s5 + $0x18] sm:$0xff]  ;;  %v432_v6 = vld [vmem:[%s2381_s5 + $0x108] sm:$0xff]  ;;  %v401_v7 = vld [vmem:[%s2381_s5 + $0x10] sm:$0xff] }
  0x34   :  { %384 = vmatprep.subr.mxu0 %v1474_v5  ;;  %1176 = vmatprep.subr.mxu1 %v430_v18  ;;  %v416_v8 = vld [vmem:[%s2381_s5 + $0x88] sm:$0xff]  ;;  %v431_v9 = vld [vmem:[%s2381_s5 + $0x100] sm:$0xff]  ;;  %v626_v13 = vld [vmem:[%s2383_s7 + $0xf8] sm:$0xff] }
  0x35   :  { %385 = vmatpush2.msra.mxu0 %v212_v11  ;;  %v400_v10 = vld [vmem:[%s2381_s5 + $0x8] sm:$0xff]  ;;  %v415_v11 = vld [vmem:[%s2381_s5 + $0x80] sm:$0xff] }
  0x36   :  { %386 = vmatprep.subr.mxu0 %v1474_v5  ;;  %v399_v12 = vld [vmem:[%s2381_s5] sm:$0xff] }
  0x37   :  { %387 = vmatpush2.msra.mxu0 %v209_v14  ;;  %v237_v14 = vsub.s32 2, %v1826_v20  ;;  %v225_v15 = vld [vmem:[%s2380_s4] sm:$0x7]  ;;  %v638_v20 = vld [vmem:[%s2383_s7 + $0x158] sm:$0xff] }
  0x38   :  { %388 = vmatprep.subr.mxu0 %v1474_v5  ;;  %v234_v18 = vrot.slane %v225_v15, %v68_v23  ;;  %v610_v23 = vld [vmem:[%s2383_s7 + $0x78] sm:$0xff] }
  0x39   :  { %389 = vmatpush2.msra.mxu0 %v206_v17  ;;  %v238_v16 = vrot.slane %v225_v15, %v237_v14  ;;  %v230_v17 = vrot.slane %v225_v15, %v64_v21  ;;  %v815_v14 = vld [vmem:[%s2385_s9 + $0xe0] sm:$0xff] }
  0x3a   :  { %1335 = vmatprep.subr.mxu0 %v1474_v5  ;;  %v611_v15 = vld [vmem:[%s2383_s7 + $0x80] sm:$0xff] }
  0xcc   :  { %v149_v26 = vpop.f32.mrf.mxu0 }
  0xcd   :  { %v150_v27 = vadd.f32 %v149_v26, %v65_v24 }
  0xce   :  { %v151_v28 = vpop.f32.mrf.mxu0 }
  0xcf   :  { %v152_v29 = vadd.f32 %v151_v28, %v69_v25  ;;  %v154_v31 = vmax.f32 %v150_v27, 0.0 }
  0xd1   :  { %v155_v30 = vmax.f32 %v152_v29, 0.0 }
  0xd3   :  { %1163 = vmatprep.mubr.msk.f32.mxu1 %vm242_vm2, %v155_v30  ;;  %1165 = vmatprep.mubr.msk.f32.mxu0 %vm242_vm2, %v155_v30  ;;  %v639_v30 = vld [vmem:[%s2383_s7 + $0x160] sm:$0xff] }
  0xd4   :  { %320 = vmatmul.mubr.f32.vlgmr.msra.gmra.mxu1 %v154_v31  ;;  %391 = vmatmul.mubr.f32.vlgmr.msra.gmra.mxu0 %v154_v31 }
  0xd5   :  { %1177 = vmatpush3.msra.mxu1 %v414_v32  ;;  %1336 = vmatpush3.msra.mxu0 %v443_v33  ;;  %v625_v32 = vld [vmem:[%s2383_s7 + $0xf0] sm:$0xff] }
  0xd6   :  { %1178 = vmatprep.subr.mxu1 %v429_v34  ;;  %1337 = vmatprep.subr.mxu0 %v1474_v5  ;;  %v637_v33 = vld [vmem:[%s2383_s7 + $0x150] sm:$0xff] }
  0xd7   :  { %1179 = vmatpush3.msra.mxu1 %v413_v35  ;;  %1338 = vmatpush3.msra.mxu0 %v442_v36  ;;  %v609_v34 = vld [vmem:[%s2383_s7 + $0x70] sm:$0xff]  ;;  %v624_v35 = vld [vmem:[%s2383_s7 + $0xe8] sm:$0xff] }
  0xd8   :  { %1180 = vmatprep.subr.mxu1 %v428_v37  ;;  %1339 = vmatprep.subr.mxu0 %v1474_v5  ;;  %v636_v36 = vld [vmem:[%s2383_s7 + $0x148] sm:$0xff] }
  0xd9   :  { %1181 = vmatpush3.msra.mxu1 %v412_v38  ;;  %1340 = vmatpush3.msra.mxu0 %v441_v39  ;;  %v608_v37 = vld [vmem:[%s2383_s7 + $0x68] sm:$0xff]  ;;  %v623_v38 = vld [vmem:[%s2383_s7 + $0xe0] sm:$0xff] }
  0xda   :  { %1182 = vmatprep.subr.mxu1 %v427_v40  ;;  %1341 = vmatprep.subr.mxu0 %v1474_v5  ;;  %v635_v39 = vld [vmem:[%s2383_s7 + $0x140] sm:$0xff] }
  0xdb   :  { %1183 = vmatpush3.msra.mxu1 %v411_v41  ;;  %1342 = vmatpush3.msra.mxu0 %v440_v42  ;;  %v607_v40 = vld [vmem:[%s2383_s7 + $0x60] sm:$0xff]  ;;  %v622_v41 = vld [vmem:[%s2383_s7 + $0xd8] sm:$0xff] }
  0xdc   :  { %1184 = vmatprep.subr.mxu1 %v426_v43  ;;  %1343 = vmatprep.subr.mxu0 %v1474_v5  ;;  %v634_v42 = vld [vmem:[%s2383_s7 + $0x138] sm:$0xff] }
  0xdd   :  { %1185 = vmatpush3.msra.mxu1 %v410_v44  ;;  %1344 = vmatpush3.msra.mxu0 %v439_v45  ;;  %v606_v43 = vld [vmem:[%s2383_s7 + $0x58] sm:$0xff]  ;;  %v621_v44 = vld [vmem:[%s2383_s7 + $0xd0] sm:$0xff] }
  0xde   :  { %1186 = vmatprep.subr.mxu1 %v425_v46  ;;  %1345 = vmatprep.subr.mxu0 %v1474_v5  ;;  %v633_v45 = vld [vmem:[%s2383_s7 + $0x130] sm:$0xff] }
  0xdf   :  { %1187 = vmatpush3.msra.mxu1 %v409_v47  ;;  %1346 = vmatpush3.msra.mxu0 %v438_v48  ;;  %v605_v46 = vld [vmem:[%s2383_s7 + $0x50] sm:$0xff]  ;;  %v620_v47 = vld [vmem:[%s2383_s7 + $0xc8] sm:$0xff] }
  0xe0   :  { %1188 = vmatprep.subr.mxu1 %v424_v49  ;;  %1347 = vmatprep.subr.mxu0 %v1474_v5  ;;  %v632_v48 = vld [vmem:[%s2383_s7 + $0x128] sm:$0xff] }
  0xe1   :  { %1189 = vmatpush3.msra.mxu1 %v408_v50  ;;  %1348 = vmatpush3.msra.mxu0 %v437_v51  ;;  %v604_v49 = vld [vmem:[%s2383_s7 + $0x48] sm:$0xff]  ;;  %v619_v50 = vld [vmem:[%s2383_s7 + $0xc0] sm:$0xff] }
  0xe2   :  { %1190 = vmatprep.subr.mxu1 %v423_v52  ;;  %1349 = vmatprep.subr.mxu0 %v1474_v5  ;;  %v631_v51 = vld [vmem:[%s2383_s7 + $0x120] sm:$0xff] }
  0xe3   :  { %1191 = vmatpush3.msra.mxu1 %v407_v53  ;;  %1350 = vmatpush3.msra.mxu0 %v436_v54  ;;  %v603_v52 = vld [vmem:[%s2383_s7 + $0x40] sm:$0xff]  ;;  %v618_v53 = vld [vmem:[%s2383_s7 + $0xb8] sm:$0xff] }
  0xe4   :  { %1192 = vmatprep.subr.mxu1 %v422_v55  ;;  %1351 = vmatprep.subr.mxu0 %v1474_v5  ;;  %v630_v54 = vld [vmem:[%s2383_s7 + $0x118] sm:$0xff] }
  0xe5   :  { %1193 = vmatpush3.msra.mxu1 %v406_v56  ;;  %1352 = vmatpush3.msra.mxu0 %v435_v57  ;;  %v602_v55 = vld [vmem:[%s2383_s7 + $0x38] sm:$0xff]  ;;  %v617_v56 = vld [vmem:[%s2383_s7 + $0xb0] sm:$0xff] }
  0xe6   :  { %1194 = vmatprep.subr.mxu1 %v421_v58  ;;  %1353 = vmatprep.subr.mxu0 %v1474_v5  ;;  %v629_v57 = vld [vmem:[%s2383_s7 + $0x110] sm:$0xff] }
  0xe7   :  { %1195 = vmatpush3.msra.mxu1 %v405_v59  ;;  %1354 = vmatpush3.msra.mxu0 %v434_v60  ;;  %v601_v58 = vld [vmem:[%s2383_s7 + $0x30] sm:$0xff]  ;;  %v616_v59 = vld [vmem:[%s2383_s7 + $0xa8] sm:$0xff] }
  0xe8   :  { %1196 = vmatprep.subr.mxu1 %v420_v61  ;;  %1355 = vmatprep.subr.mxu0 %v1474_v5  ;;  %v628_v60 = vld [vmem:[%s2383_s7 + $0x108] sm:$0xff] }
  0xe9   :  { %1197 = vmatpush3.msra.mxu1 %v404_v62  ;;  %1356 = vmatpush3.msra.mxu0 %v433_v63  ;;  %v600_v61 = vld [vmem:[%s2383_s7 + $0x28] sm:$0xff]  ;;  %v615_v62 = vld [vmem:[%s2383_s7 + $0xa0] sm:$0xff] }
  0xea   :  { %1198 = vmatprep.subr.mxu1 %v419_v0  ;;  %1357 = vmatprep.subr.mxu0 %v1474_v5  ;;  %v627_v63 = vld [vmem:[%s2383_s7 + $0x100] sm:$0xff] }
  0xeb   :  { %1199 = vmatpush3.msra.mxu1 %v403_v1  ;;  %1358 = vmatpush3.msra.mxu0 %v432_v6  ;;  %v599_v0 = vld [vmem:[%s2383_s7 + $0x20] sm:$0xff]  ;;  %v818_v1 = vld [vmem:[%s2385_s9 + $0xf8] sm:$0xff]  ;;  %v817_v6 = vld [vmem:[%s2385_s9 + $0xf0] sm:$0xff] }
  0xec   :  { %1200 = vmatprep.subr.mxu1 %v418_v2  ;;  %1359 = vmatprep.subr.mxu0 %v1474_v5  ;;  %v614_v2 = vld [vmem:[%s2383_s7 + $0x98] sm:$0xff] }
  0xed   :  { %1201 = vmatpush3.msra.mxu1 %v402_v3  ;;  %1360 = vmatpush3.msra.mxu0 %v431_v9  ;;  %v802_v3 = vld [vmem:[%s2385_s9 + $0x78] sm:$0xff]  ;;  %v597_v9 = vld [vmem:[%s2383_s7 + $0x10] sm:$0xff] }
  0xee   :  { %1202 = vmatprep.subr.mxu1 %v417_v4  ;;  %1361 = vmatprep.mubr.msk.f32.mxu0 %vm1475_vm3, %v1474_v5  ;;  %v598_v4 = vld [vmem:[%s2383_s7 + $0x18] sm:$0xff] }
  0xef   :  { %1203 = vmatpush3.msra.mxu1 %v401_v7  ;;  %1364 = vmatprep.subr.mxu0 %v1474_v5  ;;  %v613_v7 = vld [vmem:[%s2383_s7 + $0x90] sm:$0xff] }
  0xf0   :  { %1204 = vmatprep.subr.mxu1 %v416_v8  ;;  %v801_v8 = vld [vmem:[%s2385_s9 + $0x70] sm:$0xff] }
  0xf1   :  { %1205 = vmatpush3.msra.mxu1 %v400_v10  ;;  %v816_v10 = vld [vmem:[%s2385_s9 + $0xe8] sm:$0xff] }
  0xf2   :  { %1206 = vmatprep.subr.mxu1 %v415_v11  ;;  %v612_v11 = vld [vmem:[%s2383_s7 + $0x88] sm:$0xff] }
  0xf3   :  { %1207 = vmatpush3.msra.mxu1 %v399_v12  ;;  %v800_v12 = vld [vmem:[%s2385_s9 + $0x68] sm:$0xff] }
  0xf4   :  { %1225 = vmatprep.subr.mxu1 %v626_v13  ;;  %v596_v13 = vld [vmem:[%s2383_s7 + $0x8] sm:$0xff] }
 0x194   :  { %v321_v19 = vpop.f32.mrf.mxu1  ;;  %v392_v22 = vpop.f32.mrf.mxu0 }
 0x195   :  { %v393_v24 = vadd.f32 %v392_v22, %v238_v16  ;;  %v322_v25 = vadd.f32 %v321_v19, %v230_v17  ;;  %v799_v16 = vld [vmem:[%s2385_s9 + $0x60] sm:$0xff]  ;;  %v798_v19 = vld [vmem:[%s2385_s9 + $0x58] sm:$0xff]  ;;  %v813_v22 = vld [vmem:[%s2385_s9 + $0xd0] sm:$0xff] }
 0x196   :  { %v323_v26 = vpop.f32.mrf.mxu1  ;;  %v394_v27 = vpop.f32.mrf.mxu0  ;;  %v595_v17 = vld [vmem:[%s2383_s7] sm:$0xff] }
 0x197   :  { %v1995_v28 = vmax.f32 %v393_v24, 0.0  ;;  %v324_v29 = vadd.f32 %v323_v26, %v234_v18  ;;  %v2007_v21 = vmax.f32 %v322_v25, 0.0  ;;  %v814_v18 = vld [vmem:[%s2385_s9 + $0xd8] sm:$0xff]  ;;  %v831_v24 = vld [vmem:[%s2385_s9 + $0x160] sm:$0xff]  ;;  %v797_v25 = vld [vmem:[%s2385_s9 + $0x50] sm:$0xff] }
 0x198   :  { %v812_v26 = vld [vmem:[%s2385_s9 + $0xc8] sm:$0xff]  ;;  %v830_v27 = vld [vmem:[%s2385_s9 + $0x158] sm:$0xff] }
 0x199   :  { %v2000_v31 = vmax.f32 %v324_v29, 0.0  ;;  %1362 = vmatmul.mubr.msk.f32.vlgmr.msra.gmra.mxu0 %vm451_vm4, %v1995_v28  ;;  %v796_v29 = vld [vmem:[%s2385_s9 + $0x48] sm:$0xff] }
 0x19a   :  { %1365 = vmatpush3.msra.mxu0 %v639_v30  ;;  %1390 = vmatprep.mubr.msk.f32.mxu0 %vm1475_vm3, %v1474_v5  ;;  %v811_v30 = vld [vmem:[%s2385_s9 + $0xc0] sm:$0xff] }
 0x19b   :  { %1366 = vmatprep.subr.mxu0 %v1474_v5  ;;  %519 = vmatprep.mubr.f32.mxu1 %v2000_v31 }
 0x19c   :  { %1367 = vmatpush3.msra.mxu0 %v638_v20  ;;  %520 = vmatmul.mubr.f32.vlgmr.msra.gmra.mxu1 %v2007_v21  ;;  %v795_v20 = vld [vmem:[%s2385_s9 + $0x40] sm:$0xff] }
 0x19d   :  { %1226 = vmatpush3.msra.mxu1 %v610_v23  ;;  %1368 = vmatprep.subr.mxu0 %v1474_v5  ;;  %v810_v23 = vld [vmem:[%s2385_s9 + $0xb8] sm:$0xff] }
 0x19e   :  { %1227 = vmatprep.subr.mxu1 %v625_v32  ;;  %711 = vmatprep.mubr.f32.mxu1 %v2000_v31  ;;  %v828_v32 = vld [vmem:[%s2385_s9 + $0x148] sm:$0xff] }
 0x19f   :  { %1369 = vmatpush3.msra.mxu0 %v637_v33  ;;  %1228 = vmatpush3.msra.mxu1 %v609_v34  ;;  %v794_v33 = vld [vmem:[%s2385_s9 + $0x38] sm:$0xff]  ;;  %v809_v34 = vld [vmem:[%s2385_s9 + $0xb0] sm:$0xff] }
 0x1a0   :  { %1370 = vmatprep.subr.mxu0 %v1474_v5  ;;  %1229 = vmatprep.subr.mxu1 %v624_v35  ;;  %v827_v35 = vld [vmem:[%s2385_s9 + $0x140] sm:$0xff] }
 0x1a1   :  { %1371 = vmatpush3.msra.mxu0 %v636_v36  ;;  %1230 = vmatpush3.msra.mxu1 %v608_v37  ;;  %v793_v36 = vld [vmem:[%s2385_s9 + $0x30] sm:$0xff]  ;;  %v808_v37 = vld [vmem:[%s2385_s9 + $0xa8] sm:$0xff] }
 0x1a2   :  { %1372 = vmatprep.subr.mxu0 %v1474_v5  ;;  %1231 = vmatprep.subr.mxu1 %v623_v38  ;;  %v826_v38 = vld [vmem:[%s2385_s9 + $0x138] sm:$0xff] }
 0x1a3   :  { %1373 = vmatpush3.msra.mxu0 %v635_v39  ;;  %1232 = vmatpush3.msra.mxu1 %v607_v40  ;;  %v792_v39 = vld [vmem:[%s2385_s9 + $0x28] sm:$0xff]  ;;  %v807_v40 = vld [vmem:[%s2385_s9 + $0xa0] sm:$0xff] }
 0x1a4   :  { %1374 = vmatprep.subr.mxu0 %v1474_v5  ;;  %1233 = vmatprep.subr.mxu1 %v622_v41  ;;  %v825_v41 = vld [vmem:[%s2385_s9 + $0x130] sm:$0xff] }
 0x1a5   :  { %1375 = vmatpush3.msra.mxu0 %v634_v42  ;;  %1234 = vmatpush3.msra.mxu1 %v606_v43  ;;  %v791_v42 = vld [vmem:[%s2385_s9 + $0x20] sm:$0xff]  ;;  %v806_v43 = vld [vmem:[%s2385_s9 + $0x98] sm:$0xff] }
 0x1a6   :  { %1376 = vmatprep.subr.mxu0 %v1474_v5  ;;  %1235 = vmatprep.subr.mxu1 %v621_v44  ;;  %v824_v44 = vld [vmem:[%s2385_s9 + $0x128] sm:$0xff] }
 0x1a7   :  { %1377 = vmatpush3.msra.mxu0 %v633_v45  ;;  %1236 = vmatpush3.msra.mxu1 %v605_v46  ;;  %v790_v45 = vld [vmem:[%s2385_s9 + $0x18] sm:$0xff]  ;;  %v805_v46 = vld [vmem:[%s2385_s9 + $0x90] sm:$0xff] }
 0x1a8   :  { %1378 = vmatprep.subr.mxu0 %v1474_v5  ;;  %1237 = vmatprep.subr.mxu1 %v620_v47  ;;  %v823_v47 = vld [vmem:[%s2385_s9 + $0x120] sm:$0xff] }
 0x1a9   :  { %1379 = vmatpush3.msra.mxu0 %v632_v48  ;;  %1238 = vmatpush3.msra.mxu1 %v604_v49  ;;  %v789_v48 = vld [vmem:[%s2385_s9 + $0x10] sm:$0xff]  ;;  %v804_v49 = vld [vmem:[%s2385_s9 + $0x88] sm:$0xff] }
 0x1aa   :  { %1380 = vmatprep.subr.mxu0 %v1474_v5  ;;  %1239 = vmatprep.subr.mxu1 %v619_v50  ;;  %v822_v50 = vld [vmem:[%s2385_s9 + $0x118] sm:$0xff] }
 0x1ab   :  { %1381 = vmatpush3.msra.mxu0 %v631_v51  ;;  %1240 = vmatpush3.msra.mxu1 %v603_v52  ;;  %v788_v51 = vld [vmem:[%s2385_s9 + $0x8] sm:$0xff]  ;;  %v803_v52 = vld [vmem:[%s2385_s9 + $0x80] sm:$0xff] }
 0x1ac   :  { %1382 = vmatprep.subr.mxu0 %v1474_v5  ;;  %1241 = vmatprep.subr.mxu1 %v618_v53  ;;  %v821_v53 = vld [vmem:[%s2385_s9 + $0x110] sm:$0xff] }
 0x1ad   :  { %1383 = vmatpush3.msra.mxu0 %v630_v54  ;;  %1242 = vmatpush3.msra.mxu1 %v602_v55  ;;  %v787_v54 = vld [vmem:[%s2385_s9] sm:$0xff]  ;;  %v820_v55 = vld [vmem:[%s2385_s9 + $0x108] sm:$0xff] }
 0x1ae   :  { %1384 = vmatprep.subr.mxu0 %v1474_v5  ;;  %1243 = vmatprep.subr.mxu1 %v617_v56  ;;  %v1061_v56 = vld [vmem:[%s2388_s12 + $0x20] sm:$0xf] }
 0x1af   :  { %1385 = vmatpush3.msra.mxu0 %v629_v57  ;;  %1244 = vmatpush3.msra.mxu1 %v601_v58  ;;  %v819_v57 = vld [vmem:[%s2385_s9 + $0x100] sm:$0xff]  ;;  %v1060_v58 = vld [vmem:[%s2388_s12 + $0x18] sm:$0xff] }
 0x1b0   :  { %1386 = vmatprep.subr.mxu0 %v1474_v5  ;;  %1245 = vmatprep.subr.mxu1 %v616_v59  ;;  %v983_v59 = vld [vmem:[%s2387_s11 + $0x20] sm:$0xf] }
 0x1b1   :  { %1387 = vmatpush3.msra.mxu0 %v628_v60  ;;  %1246 = vmatpush3.msra.mxu1 %v600_v61  ;;  %v982_v60 = vld [vmem:[%s2387_s11 + $0x18] sm:$0xff]  ;;  %v981_v61 = vld [vmem:[%s2387_s11 + $0x10] sm:$0xff] }
 0x1b2   :  { %1388 = vmatprep.subr.mxu0 %v1474_v5  ;;  %1247 = vmatprep.subr.mxu1 %v615_v62  ;;  %v1057_v62 = vld [vmem:[%s2388_s12] sm:$0xff] }
 0x1b3   :  { %1389 = vmatpush3.msra.mxu0 %v627_v63  ;;  %1248 = vmatpush3.msra.mxu1 %v599_v0  ;;  %v980_v63 = vld [vmem:[%s2387_s11 + $0x8] sm:$0xff]  ;;  %v979_v0 = vld [vmem:[%s2387_s11] sm:$0xff] }
 0x1b4   :  { %1391 = vmatmul.mubr.msk.f32.vlgmr.msra.gmra.mxu0 %vm451_vm4, %v1995_v28  ;;  %1274 = vmatprep.subr.mxu0 %v818_v1  ;;  %v1451_v1 = vld [vmem:[%s2376_s0] sm:$0xff] }
 0x1b5   :  { %1249 = vmatprep.subr.mxu1 %v614_v2  ;;  %1275 = vmatpush3.msra.mxu0 %v802_v3 }
 0x1b6   :  { %903 = vmatprep.mubr.f32.mxu0 %v2000_v31  ;;  %1250 = vmatpush3.msra.mxu1 %v598_v4  ;;  %v829_v31 = vld [vmem:[%s2385_s9 + $0x150] sm:$0xff] }
 0x1b7   :  { %1276 = vmatprep.subr.mxu0 %v817_v6  ;;  %1251 = vmatprep.subr.mxu1 %v613_v7 }
 0x1b8   :  { %1277 = vmatpush3.msra.mxu0 %v801_v8  ;;  %1252 = vmatpush3.msra.mxu1 %v597_v9 }
 0x1b9   :  { %1278 = vmatprep.subr.mxu0 %v816_v10  ;;  %1253 = vmatprep.subr.mxu1 %v612_v11 }
 0x1ba   :  { %1279 = vmatpush3.msra.mxu0 %v800_v12  ;;  %1254 = vmatpush3.msra.mxu1 %v596_v13 }
 0x1bb   :  { %1280 = vmatprep.subr.mxu0 %v815_v14  ;;  %1255 = vmatprep.subr.mxu1 %v611_v15  ;;  %v1166_v14 = vld [vmem:[%s2382_s6] ss:$0 sm:$0xff]  ;;  %s1476_s6 = smov [#allocation3]  }
 0x1bc   :  { %1281 = vmatpush3.msra.mxu0 %v799_v16  ;;  %1256 = vmatpush3.msra.mxu1 %v595_v17  ;;  %v1168_v17 = vld [vmem:[%s2384_s8] ss:$0 sm:$0xff]  ;;  %s1150_s8 = sshll.u32 %s1476_s6, 4  ;;  %s1151_s8 = int_to_ptr.vmem [resolvable:$true] %s1150_s8 }
 0x1bd   :  { %1282 = vmatprep.subr.mxu0 %v814_v18  ;;  %712 = vmatmul.mubr.f32.vlgmr.msra.gmra.mxu1 %v2007_v21  ;;  %p1457_p1 = scmp.lt.s32.totalorder %s1151_s8, %s1151_s8 }
 0x1be   :  { %1283 = vmatpush3.msra.mxu0 %v798_v19  ;;  %1393 = vmatprep.subr.mxu1 %v1474_v5 }
 0x1bf   :  { %1284 = vmatprep.subr.mxu0 %v813_v22  ;;  %1394 = vmatpush3.msra.mxu1 %v831_v24  ;;  %v1170_v22 = vld [vmem:[%s2386_s10] ss:$0 sm:$0xff]  ;;  %v1136_v24 = vstv %s2389_s13  ;;  %s1452_s10 = scalar_lea.vmem %s1151_s8, 128 }
 0x1c0   :  { %1285 = vmatpush3.msra.mxu0 %v797_v25  ;;  %1395 = vmatprep.subr.mxu1 %v1474_v5  ;;  %p1453_p0 = scmp.ne.s32.totalorder %s1151_s8, %s1452_s10  ;;  %p1458_p2 = scmp.lt.s32.totalorder %s1452_s10, %s1452_s10 }
 0x1c1   :  { %1286 = vmatprep.subr.mxu0 %v812_v26  ;;  %1396 = vmatpush3.msra.mxu1 %v830_v27 }
 0x1c2   :  { %1287 = vmatpush3.msra.mxu0 %v796_v29  ;;  %1397 = vmatprep.subr.mxu1 %v1474_v5  ;;  %p1459_p3 = por %p1458_p2, %p1457_p1 }
 0x1c3   :  { %1288 = vmatprep.subr.mxu0 %v811_v30  ;;  %1398 = vmatpush3.msra.mxu1 %v829_v31  ;;  %v1137_v30 = vmul.f32 %v1451_v1, %v1136_v24 }
 0x1c4   :  { %1289 = vmatpush3.msra.mxu0 %v795_v20  ;;  %1399 = vmatprep.subr.mxu1 %v1474_v5  ;;  %p1460_p4 = pnand %p1459_p3, %p1453_p0 }
 0x1c5   :  { %1290 = vmatprep.subr.mxu0 %v810_v23  ;;  %1400 = vmatpush3.msra.mxu1 %v828_v32 }
 0x1c6   :  { %1291 = vmatpush3.msra.mxu0 %v794_v33  ;;  %1401 = vmatprep.subr.mxu1 %v1474_v5 }
 0x1c7   :  { %1292 = vmatprep.subr.mxu0 %v809_v34  ;;  %1402 = vmatpush3.msra.mxu1 %v827_v35 }
 0x1c8   :  { %1293 = vmatpush3.msra.mxu0 %v793_v36  ;;  %1403 = vmatprep.subr.mxu1 %v1474_v5 }
 0x1c9   :  { %1294 = vmatprep.subr.mxu0 %v808_v37  ;;  %1404 = vmatpush3.msra.mxu1 %v826_v38 }
 0x1ca   :  { %1295 = vmatpush3.msra.mxu0 %v792_v39  ;;  %1405 = vmatprep.subr.mxu1 %v1474_v5 }
 0x1cb   :  { %1296 = vmatprep.subr.mxu0 %v807_v40  ;;  %1406 = vmatpush3.msra.mxu1 %v825_v41 }
 0x1cc   :  { %1297 = vmatpush3.msra.mxu0 %v791_v42  ;;  %1407 = vmatprep.subr.mxu1 %v1474_v5 }
 0x1cd   :  { %1298 = vmatprep.subr.mxu0 %v806_v43  ;;  %1408 = vmatpush3.msra.mxu1 %v824_v44 }
 0x1ce   :  { %1299 = vmatpush3.msra.mxu0 %v790_v45  ;;  %1409 = vmatprep.subr.mxu1 %v1474_v5 }
 0x1cf   :  { %1300 = vmatprep.subr.mxu0 %v805_v46  ;;  %1410 = vmatpush3.msra.mxu1 %v823_v47 }
 0x1d0   :  { %1301 = vmatpush3.msra.mxu0 %v789_v48  ;;  %1411 = vmatprep.subr.mxu1 %v1474_v5 }
 0x1d1   :  { %1302 = vmatprep.subr.mxu0 %v804_v49  ;;  %1412 = vmatpush3.msra.mxu1 %v822_v50 }
 0x1d2   :  { %1303 = vmatpush3.msra.mxu0 %v788_v51  ;;  %1413 = vmatprep.subr.mxu1 %v1474_v5 }
 0x1d3   :  { %1304 = vmatprep.subr.mxu0 %v803_v52  ;;  %1414 = vmatpush3.msra.mxu1 %v821_v53 }
 0x1d4   :  { %1305 = vmatpush3.msra.mxu0 %v787_v54  ;;  %1415 = vmatprep.subr.mxu1 %v1474_v5 }
 0x1d5   :  { %904 = vmatmul.mubr.f32.vlgmr.msra.gmra.mxu0 %v2007_v21  ;;  %1416 = vmatpush3.msra.mxu1 %v820_v55  ;;  %v1059_v21 = vld [vmem:[%s2388_s12 + $0x10] sm:$0xff] }
 0x1d6   :  { %1435 = vmatprep.subr.mxu0 %v1474_v5  ;;  %1417 = vmatprep.subr.mxu1 %v1474_v5 }
 0x1d7   :  { %1436 = vmatpush3.msk.msra.mxu0 %vm76_vm0, %v1061_v56  ;;  %1418 = vmatpush3.msra.mxu1 %v819_v57 }
 0x1d8   :  { %1419 = vmatprep.mubr.msk.f32.mxu1 %vm1475_vm3, %v1474_v5  ;;  %1437 = vmatprep.subr.mxu0 %v1474_v5 }
 0x1d9   :  { %1420 = vmatmul.mubr.msk.f32.vlgmr.msra.gmra.mxu1 %vm451_vm4, %v1995_v28  ;;  %1422 = vmatprep.subr.mxu1 %v1474_v5  ;;  %v1058_v28 = vld [vmem:[%s2388_s12 + $0x8] sm:$0xff] }
 0x1da   :  { %1438 = vmatpush3.msra.mxu0 %v1060_v58  ;;  %1423 = vmatpush3.msk.msra.mxu1 %vm76_vm0, %v983_v59 }
 0x1db   :  { %1439 = vmatprep.subr.mxu0 %v1474_v5  ;;  %1424 = vmatprep.subr.mxu1 %v1474_v5 }
 0x1dc   :  { %1440 = vmatpush3.msra.mxu0 %v1059_v21  ;;  %1425 = vmatpush3.msra.mxu1 %v982_v60 }
 0x1dd   :  { %1441 = vmatprep.subr.mxu0 %v1474_v5  ;;  %1426 = vmatprep.subr.mxu1 %v1474_v5 }
 0x1de   :  { %1442 = vmatpush3.msra.mxu0 %v1058_v28  ;;  %1427 = vmatpush3.msra.mxu1 %v981_v61 }
 0x1df   :  { %1443 = vmatprep.subr.mxu0 %v1474_v5  ;;  %1428 = vmatprep.subr.mxu1 %v1474_v5 }
 0x1e0   :  { %1444 = vmatpush3.msra.mxu0 %v1057_v62  ;;  %1445 = vmatprep.mubr.msk.f32.mxu0 %vm1475_vm3, %v1474_v5 }
 0x1e1   :  { %1429 = vmatpush3.msra.mxu1 %v980_v63  ;;  %1446 = vmatmul.mubr.msk.f32.vlgmr.msra.gmra.mxu0 %vm72_vm1, %v1451_v1 }
 0x1e2   :  { %1430 = vmatprep.subr.mxu1 %v1474_v5  ;;  %1432 = vmatprep.mubr.msk.f32.mxu1 %vm1475_vm3, %v1474_v5 }
 0x1e3   :  { %1431 = vmatpush3.msra.mxu1 %v979_v0 }
 0x1e4   :  { %1433 = vmatmul.mubr.msk.f32.vlgmr.msra.gmra.mxu1 %vm72_vm1, %v1451_v1 }
 0x259   :  { %v591_v2 = vpop.f32.mrf.mxu0 }
 0x25b   :  { %v1363_v3 = vpop.f32.mrf.mxu0 }
 0x25c   :  { %v1208_v7 = vpop.f32.mrf.mxu1 }
 0x25e   :  { %v1209_v8 = vpop.f32.mrf.mxu1 }
 0x25f   :  { %v1210_v12 = vadd.f32 %v1209_v8, %v1208_v7 }
 0x261   :  { %v522_v18 = vadd.f32 %v1210_v12, %v1166_v14 }
 0x263   :  { %v592_v26 = vadd.f32 %v591_v2, %v522_v18 }
 0x265   :  { %v1138_v33 = vadd.f32 %v1137_v30, %v592_v26 }
 0x274   :  { %v783_v4 = vpop.f32.mrf.mxu0 }
 0x276   :  { %v1392_v6 = vpop.f32.mrf.mxu0 }
 0x27d   :  { %v1257_v9 = vpop.f32.mrf.mxu1 }
 0x27f   :  { %v1258_v11 = vpop.f32.mrf.mxu1 }
 0x280   :  { %v1259_v5 = vadd.f32 %v1258_v11, %v1257_v9 }
 0x282   :  { %v714_v25 = vadd.f32 %v1259_v5, %v1168_v17 }
 0x284   :  { %v784_v31 = vadd.f32 %v783_v4, %v714_v25 }
 0x295   :  { %v1306_v10 = vpop.f32.mrf.mxu0 }
 0x297   :  { %v1307_v15 = vpop.f32.mrf.mxu0 }
 0x298   :  { %v1308_v19 = vadd.f32 %v1307_v15, %v1306_v10 }
 0x299   :  { %v975_v13 = vpop.f32.mrf.mxu1 }
 0x29a   :  { %v906_v27 = vadd.f32 %v1308_v19, %v1170_v22 }
 0x29b   :  { %v1421_v16 = vpop.f32.mrf.mxu1 }
 0x29c   :  { %v976_v32 = vadd.f32 %v975_v13, %v906_v27 }
 0x2a1   :  { %v1131_v29 = vpop.f32.mrf.mxu0 }
 0x2a2   :  { %v1141_v36 = vmul.f32 %v1131_v29, %v976_v32 }
 0x2a3   :  { %v1447_v20 = vpop.f32.mrf.mxu0 }
 0x2a4   :  { %v1053_v23 = vpop.f32.mrf.mxu1 }
 0x2a5   :  { %v1139_v34 = vmul.f32 %v1053_v23, %v784_v31 }
 0x2a6   :  { %v1434_v35 = vpop.f32.mrf.mxu1 }
 0x2a7   :  { %v1140_v37 = vadd.f32 %v1139_v34, %v1138_v33 }
 0x2a9   :  { %v1142_v38 = vadd.f32 %v1141_v36, %v1140_v37 }
 0x2ab   :  { %1143 = vst.msk [vmem:[#allocation3] sm:$0xff] %vm72_vm1, %v1142_v38 }
 0x2ac   :  { %1463 = shalt.err (!%p1460_p4)
}
 0x2ad   :  { %1153 = dma.vmem_to_hbm [thread:$0]  %s1151_s8, 128, %s2390_s14, [#allocation4]  }
 0x2ae   :  { %1472 = dma.done.wait [#allocation4], 128  }
 0x2af   :  { %1473 = vsyncadd [#allocation4], 4294967168 }
 0x2b0   :  { %1157 = vsyncpa [#allocation4], 1 }

</bundles_post_ra>
